<compile_context>
chip_gen: v6e
topology: v6e:2x2x1
jax: 0.10.0
libtpu: 0.0.40
codegen_flags: <defaults>
</compile_context>

<pallas_src>
import math

import jax
import jax.numpy as jnp
import numpy as np
from jax.experimental import pallas as pl
from jax.experimental.pallas import tpu as pltpu


# ----------------------------- in-kernel helpers -----------------------------

_SQRT_2_OVER_PI = math.sqrt(2.0 / math.pi)


def _gelu_tanh(x):
    # tanh-approximate GELU (EUP-friendly); max abs error vs erf-GELU ~5e-4, well within the
    # 2e-3 validation tolerance (and the pre-activation values here are mostly |x| < 1).
    return 0.5 * x * (1.0 + jnp.tanh(_SQRT_2_OVER_PI * (x + 0.044715 * x * x * x)))


def _sigmoid_eup(x):
    # exp on the EUP + approximate reciprocal (EUP vrcp) instead of a VPU divide.
    return pl.reciprocal(1.0 + jnp.exp(-x), approx=True)


# ------------------------ pltpu.roll direction probe --------------------------

_ROLL_PROBE_CACHE = {}


def _roll_matches_jnp():
    """One-time check of pltpu.roll's rotation convention against jnp.roll."""
    if "v" not in _ROLL_PROBE_CACHE:
        def _probe(x_ref, o_ref):
            o_ref[...] = pltpu.roll(x_ref[...], 1, 1)

        x = jax.lax.broadcasted_iota(jnp.float32, (8, 128), 1)
        got = pl.pallas_call(
            _probe, out_shape=jax.ShapeDtypeStruct((8, 128), jnp.float32)
        )(x)
        _ROLL_PROBE_CACHE["v"] = bool(jnp.array_equal(got, jnp.roll(x, 1, axis=1)))
    return _ROLL_PROBE_CACHE["v"]


# --------------------------------- the kernel --------------------------------

def _build_kernel(B, H, W, C, M, roll_matches_jnp):
    L = W * C
    L2 = W * M
    BH = B * H
    inv_hw = 1.0 / float(H * W)
    inv_m = 1.0 / float(M)

    def lane_shift(z, off):
        # returns s with s[r, l] = z[r, l + off] (wrap-around; wrapped lanes are zeroed later
        # via the per-lane weight vectors, which encode the W-boundary).
        if off == 0:
            return z
        n = z.shape[-1]
        shift = (-off) % n if roll_matches_jnp else off % n
        return pltpu.roll(z, shift, 1)

    def dwconv(z, w_ref, bias, sv_ref, k):
        """Depthwise k x k conv on the flat (BH, W*ch) slab.

        Horizontal taps: lane rolls by (dx - k//2) * ch, weighted per-lane (W-boundary zeroing
        baked into w_ref).  Vertical taps: row-shift-and-mask matmuls with the tiny (BH, BH)
        matrices in sv_ref (offsets -3..3), which also mask the image/batch boundary.
        """
        pk = k // 2
        cstep = z.shape[-1] // W
        w = w_ref[...]                                         # (k*k, lanes)
        shifted = [lane_shift(z, (dx - pk) * cstep) for dx in range(k)]
        acc = None
        for dy in range(k):
            inner = shifted[0] * w[dy * k + 0: dy * k + 1]
            for dx in range(1, k):
                inner = inner + shifted[dx] * w[dy * k + dx: dy * k + dx + 1]
            offy = dy - pk
            if offy == 0:
                contrib = inner
            else:
                contrib = jnp.dot(sv_ref[3 + offy], inner,
                                  preferred_element_type=jnp.float32)
            acc = contrib if acc is None else acc + contrib
        return acc + bias

    def kernel(x_ref, sv_ref, dw1_w_ref, mrg_w_ref, dw2_w_ref,
               pw1_e_ref, pw2_e_ref, g_ref,
               sel_ref, selT_ref, pc_ref, pcT_ref, pm_ref, pmT_ref,
               se_w1_ref, se_b1_ref, se_w2_ref, se_b2_ref,
               vec_c_ref, vec_m_ref, out_ref):
        x = x_ref[...].astype(jnp.float32)                     # (BH, W*C)

        vec_c = vec_c_ref[...]                                 # (5, W*C)
        vec_m = vec_m_ref[...]                                 # (4, W*M)
        dw1_b = vec_c[0:1]
        ln_g = vec_c[1:2]
        ln_b = vec_c[2:3]
        mrg_off = vec_c[3:4]
        pw2_b = vec_c[4:5]
        pw1_b = vec_m[0:1]
        dw2_b = vec_m[1:2]
        grn_b = vec_m[2:3]
        grn_g = vec_m[3:4]

        # ResDWConv(dim, 3):  x1 = x + (dwconv3x3(x) + bias)
        x1 = x + dwconv(x, dw1_w_ref, dw1_b, sv_ref, 3)

        # LayerNorm2d: per-pixel LayerNorm over channels, eps = 1e-6.
        # g_mat is the per-pixel channel-group averaging matrix, so x1 @ g_mat is the channel
        # mean already broadcast back to every channel lane of that pixel.
        g_mat = g_ref[...]
        mu = jnp.dot(x1, g_mat, preferred_element_type=jnp.float32)
        xc = x1 - mu
        var = jnp.dot(xc * xc, g_mat, preferred_element_type=jnp.float32)
        y = xc * jax.lax.rsqrt(var + 1e-6) * ln_g + ln_b

        # DilatedReparamBlock (7x7 + 4 dilated branches) + BatchNorm2d, merged host-side into
        # one equivalent 7x7 depthwise conv + per-channel offset (all linear ops).
        t = dwconv(y, mrg_w_ref, mrg_off, sv_ref, 7)

        # SEModule: t * sigmoid(W2 @ gelu(W1 @ avgpool(t)))   (per-image pooling/broadcast via
        # the tiny Sel / SelT selector matmuls; channel path padded to 128 lanes host-side).
        colsum = jnp.dot(sel_ref[...], t, preferred_element_type=jnp.float32)      # (Bp, W*C)
        pooled = jnp.dot(colsum, pc_ref[...],
                         preferred_element_type=jnp.float32) * inv_hw              # (Bp, 128)
        hid = _gelu_tanh(jnp.dot(pooled, se_w1_ref[...],
                                 preferred_element_type=jnp.float32) + se_b1_ref[...])
        gate = _sigmoid_eup(jnp.dot(hid, se_w2_ref[...],
                                    preferred_element_type=jnp.float32) + se_b2_ref[...])
        gate_t = jnp.dot(gate, pcT_ref[...], preferred_element_type=jnp.float32)   # (Bp, W*C)
        gate_rows = jnp.dot(selT_ref[...], gate_t,
                            preferred_element_type=jnp.float32)                    # (BH, W*C)
        t = t * gate_rows

        # 1x1 conv C -> mlp_dim (block-diagonal expanded weights) + GELU.
        u = _gelu_tanh(jnp.dot(t, pw1_e_ref[...],
                               preferred_element_type=jnp.float32) + pw1_b)        # (BH, W*M)

        # ResDWConv(mlp_dim, 3)
        u = u + dwconv(u, dw2_w_ref, dw2_b, sv_ref, 3)

        # GRN (ConvNeXt-V2): Gx = ||u||_2 over (H, W) per image/channel;
        # Nx = Gx / (mean_c Gx + 1e-6)
        ss = jnp.dot(sel_ref[...], u * u, preferred_element_type=jnp.float32)      # (Bp, W*M)
        gx = jnp.sqrt(jnp.dot(ss, pm_ref[...], preferred_element_type=jnp.float32))  # (Bp, 128)
        mean_gx = jnp.sum(gx, axis=-1, keepdims=True) * inv_m        # padded lanes are zero
        nx = gx / (mean_gx + 1e-6)
        nx_t = jnp.dot(nx, pmT_ref[...], preferred_element_type=jnp.float32)       # (Bp, W*M)
        nx_rows = jnp.dot(selT_ref[...], nx_t, preferred_element_type=jnp.float32)  # (BH, W*M)
        u = (grn_g * nx_rows + 1.0) * u + grn_b

        # 1x1 conv mlp_dim -> dim
        v = jnp.dot(u, pw2_e_ref[...], preferred_element_type=jnp.float32) + pw2_b

        # residual (ls = Identity, drop_path = Identity): out = dwconv(x) + proj(dwconv(x))
        out_ref[...] = (x1 + v).astype(out_ref.dtype)

    return kernel


# ------------------------- host-side parameter folding -------------------------

_PREP_ORDER = [
    'Sv', 'dw1_wl', 'mrg_wl', 'dw2_wl',
    'pw1_E', 'pw2_E', 'G',
    'Sel', 'SelT', 'Pc', 'PcT', 'Pm', 'PmT',
    'se_w1', 'se_b1', 'se_w2', 'se_b2',
    'vecC', 'vecM',
]


def _prepare_kernel_params(p, B, H, W, C, M):
    """Fold/repack PyTorch-style parameters into the kernel's flat-layout operands.

    All transformations are exact (linearity of convolution / BN folding):
      * the DilatedReparamBlock branches + trailing BatchNorm2d merge into one 7x7 depthwise
        kernel + per-channel offset (same math as UniRepLKNet merge_dilated_branches);
      * depthwise kernels become per-lane weight vectors (W-boundary zeroing baked in) plus
        tiny (B*H, B*H) vertical shift-and-mask matrices;
      * 1x1 convs become block-diagonal (W*Cin, W*Cout) matrices;
      * SE / GRN channel selectors are padded to 128 lanes;
      * per-channel vectors are tiled to the flat (W*C)/(W*M) lane layout and packed.
    """
    f32 = np.float32
    g = lambda k: np.asarray(p[k], f32)

    K = g('lk_w').shape[0]          # 7
    BH = B * H
    PAD = 128

    def embed(small, dil):
        k = small.shape[0]
        eq = dil * (k - 1) + 1
        pad = (K - eq) // 2
        big = np.zeros((K, K, C), f32)
        for i in range(k):
            for j in range(k):
                big[pad + i * dil, pad + j * dil, :] = small[i, j, :]
        return big

    merged = g('lk_w') * g('bn0_s')
    merged = merged + embed(g('br1_w'), 1) * g('br1_s')
    merged = merged + embed(g('br2_w'), 1) * g('br2_s')
    merged = merged + embed(g('br3_w'), 2) * g('br3_s')
    merged = merged + embed(g('br4_w'), 3) * g('br4_s')
    off = g('bn0_o') + g('br1_o') + g('br2_o') + g('br3_o') + g('br4_o')
    merged = merged * g('bn1_s')                 # fold trailing BatchNorm2d scale
    off = off * g('bn1_s') + g('bn1_o')          # ... and offset

    def dw_lane_weights(kern):
        # (k, k, ch) -> (k*k, W*ch) per-lane weights with W-boundary zeroing folded in.
        k = kern.shape[0]
        ch = kern.shape[2]
        pk = k // 2
        wl = np.zeros((k * k, W * ch), f32)
        for dy in range(k):
            for dx in range(k):
                offx = dx - pk
                for w in range(W):
                    if 0 <= w + offx < W:
                        wl[dy * k + dx, w * ch:(w + 1) * ch] = kern[dy, dx, :]
        return wl

    def pw_expand(wmat):
        cin, cout = wmat.shape
        E = np.zeros((W * cin, W * cout), f32)
        for w in range(W):
            E[w * cin:(w + 1) * cin, w * cout:(w + 1) * cout] = wmat
        return E

    def tile_vec(v):
        return np.tile(np.asarray(v, f32), W)

    # vertical row-shift-and-mask matrices for offsets -3..3 (image/batch boundary aware)
    Sv = np.zeros((7, BH, BH), f32)
    for d in range(7):
        offy = d - 3
        for r in range(BH):
            rs = r + offy
            if 0 <= rs < BH and rs // H == r // H:
                Sv[d, r, rs] = 1.0

    # per-pixel channel-mean matrix (block-diag 1/C) for LayerNorm statistics
    G = np.zeros((W * C, W * C), f32)
    for w in range(W):
        G[w * C:(w + 1) * C, w * C:(w + 1) * C] = 1.0 / C

    # per-image row selectors (padded to 8 rows / cols for clean tiling)
    Bp = max(8, ((B + 7) // 8) * 8)
    Sel = np.zeros((Bp, BH), f32)
    SelT = np.zeros((BH, Bp), f32)
    for r in range(BH):
        Sel[r // H, r] = 1.0
        SelT[r, r // H] = 1.0

    # SE / GRN channel selectors, zero-padded to 128 lanes
    Pc = np.zeros((W * C, PAD), f32)
    PcT = np.zeros((PAD, W * C), f32)
    for w in range(W):
        for c in range(C):
            Pc[w * C + c, c] = 1.0
            PcT[c, w * C + c] = 1.0
    Pm = np.zeros((W * M, PAD), f32)
    PmT = np.zeros((PAD, W * M), f32)
    for w in range(W):
        for m in range(M):
            Pm[w * M + m, m] = 1.0
            PmT[m, w * M + m] = 1.0

    inner = g('se_w1').shape[1]
    se_w1 = np.zeros((PAD, PAD), f32); se_w1[:C, :inner] = g('se_w1')
    se_w2 = np.zeros((PAD, PAD), f32); se_w2[:inner, :C] = g('se_w2')
    se_b1 = np.zeros((1, PAD), f32); se_b1[0, :inner] = g('se_b1')
    se_b2 = np.zeros((1, PAD), f32); se_b2[0, :C] = g('se_b2')

    vecC = np.stack([tile_vec(g('dw1_b')), tile_vec(g('ln_g')), tile_vec(g('ln_b')),
                     tile_vec(off), tile_vec(g('pw2_b'))])                      # (5, W*C)
    vecM = np.stack([tile_vec(g('pw1_b')), tile_vec(g('dw2_b')),
                     tile_vec(g('grn_b')), tile_vec(g('grn_g'))])               # (4, W*M)

    return dict(
        Sv=Sv,
        dw1_wl=dw_lane_weights(g('dw1_w')),
        mrg_wl=dw_lane_weights(merged),
        dw2_wl=dw_lane_weights(g('dw2_w')),
        pw1_E=pw_expand(g('pw1_w')),
        pw2_E=pw_expand(g('pw2_w')),
        G=G,
        Sel=Sel, SelT=SelT,
        Pc=Pc, PcT=PcT, Pm=Pm, PmT=PmT,
        se_w1=se_w1, se_b1=se_b1, se_w2=se_w2, se_b2=se_b2,
        vecC=vecC, vecM=vecM,
    )


# --------------------------------- wrapper ------------------------------------

def rep_conv_block(x, params):
    B, H, W, C = x.shape
    M = params['pw1_w'].shape[1]
    BH, L, L2 = B * H, W * C, W * M
    Bp = max(8, ((B + 7) // 8) * 8)

    roll_ok = _roll_matches_jnp()
    prep = _prepare_kernel_params(params, B, H, W, C, M)
    ordered = [jnp.asarray(prep[k]) for k in _PREP_ORDER]
    kernel = _build_kernel(B, H, W, C, M, roll_ok)

    x2d = x.reshape(BH, L)                       # lane-dense batched slab

    in_specs = [pl.BlockSpec((BH, L), lambda i: (0, 0))]
    for arr in ordered:
        nd = arr.ndim
        in_specs.append(pl.BlockSpec(arr.shape, lambda i, _nd=nd: (0,) * _nd))

    # advisory cost estimate for XLA's scheduler
    def _mm(m, k, n):
        return 2 * m * k * n
    flops = (
        2 * _mm(BH, L, L)                                   # LayerNorm mean / var
        + _mm(BH, L, L2) + _mm(BH, L2, L)                   # pw1 / pw2
        + (2 + 6) * _mm(BH, BH, L) + 2 * _mm(BH, BH, L2)    # vertical shift matmuls
        + 2 * BH * L * (9 + 49) + 2 * BH * L2 * 9           # depthwise per-lane FMAs
        + _mm(Bp, BH, L) + _mm(Bp, L, 128) + 2 * _mm(Bp, 128, 128)
        + _mm(Bp, 128, L) + _mm(BH, Bp, L)                  # SE
        + _mm(Bp, BH, L2) + _mm(Bp, L2, 128)
        + _mm(Bp, 128, L2) + _mm(BH, Bp, L2)                # GRN
    )
    transcendentals = BH * L2 + BH * L + 4 * Bp * 128
    bytes_accessed = 4 * (2 * BH * L + sum(int(a.size) for a in ordered))

    out = pl.pallas_call(
        kernel,
        out_shape=jax.ShapeDtypeStruct((BH, L), x.dtype),
        grid=(1,),                               # whole batch in one step (B is tiny)
        in_specs=in_specs,
        out_specs=pl.BlockSpec((BH, L), lambda i: (0, 0)),
        compiler_params=pltpu.CompilerParams(dimension_semantics=("arbitrary",)),
        cost_estimate=pl.CostEstimate(flops=int(flops),
                                      transcendentals=int(transcendentals),
                                      bytes_accessed=int(bytes_accessed)),
    )(x2d, *ordered)

    return out.reshape(B, H, W, C)


# ---------------------------- pure-JAX reference ------------------------------
# (operates on the ORIGINAL, unmerged parameters and exact erf-GELU / sigmoid, so it also
#  validates the host-side branch merging, lane-weight construction and matrix expansion)

def _dwconv_ref(x, w, dilation):
    K = w.shape[0]
    Cc = w.shape[-1]
    pad = (dilation * (K - 1) + 1) // 2
    return jax.lax.conv_general_dilated(
        x, w.reshape(K, K, 1, Cc),
        window_strides=(1, 1),
        padding=[(pad, pad), (pad, pad)],
        rhs_dilation=(dilation, dilation),
        dimension_numbers=('NHWC', 'HWIO', 'NHWC'),
        feature_group_count=Cc)


def rep_conv_block_ref(x, p):
    x1 = x + _dwconv_ref(x, p['dw1_w'], 1) + p['dw1_b']
    mu = jnp.mean(x1, axis=-1, keepdims=True)
    var = jnp.mean((x1 - mu) ** 2, axis=-1, keepdims=True)
    y = (x1 - mu) / jnp.sqrt(var + 1e-6) * p['ln_g'] + p['ln_b']
    out = _dwconv_ref(y, p['lk_w'], 1) * p['bn0_s'] + p['bn0_o']
    out = out + _dwconv_ref(y, p['br1_w'], 1) * p['br1_s'] + p['br1_o']
    out = out + _dwconv_ref(y, p['br2_w'], 1) * p['br2_s'] + p['br2_o']
    out = out + _dwconv_ref(y, p['br3_w'], 2) * p['br3_s'] + p['br3_o']
    out = out + _dwconv_ref(y, p['br4_w'], 3) * p['br4_s'] + p['br4_o']
    t = out * p['bn1_s'] + p['bn1_o']
    pooled = jnp.mean(t, axis=(1, 2))
    h = jax.nn.gelu(pooled @ p['se_w1'] + p['se_b1'], approximate=False)
    gate = jax.nn.sigmoid(h @ p['se_w2'] + p['se_b2'])
    t = t * gate[:, None, None, :]
    u = jax.nn.gelu(jnp.einsum('bhwc,cm->bhwm', t, p['pw1_w']) + p['pw1_b'],
                    approximate=False)
    u = u + _dwconv_ref(u, p['dw2_w'], 1) + p['dw2_b']
    gx = jnp.sqrt(jnp.sum(u * u, axis=(1, 2), keepdims=True))
    nx = gx / (jnp.mean(gx, axis=-1, keepdims=True) + 1e-6)
    u = (p['grn_g'] * nx + 1.0) * u + p['grn_b']
    v = jnp.einsum('bhwm,mc->bhwc', u, p['pw2_w']) + p['pw2_b']
    return x1 + v


# --------------------------- deterministic params -----------------------------

def init_params(key, dim=8, kernel_size=7, mlp_ratio=4):
    assert kernel_size == 7  # DilatedReparamBlock branch config below is for ks=7
    M = dim * mlp_ratio
    inner = max(16, dim // 8)
    keys = iter(jax.random.split(key, 64))

    def nrm(shape, scale=0.1):
        return (scale * jax.random.normal(next(keys), shape)).astype(jnp.float32)

    def bn_fold(c, eps=1e-5):
        gamma = 1.0 + nrm((c,))
        beta = nrm((c,))
        mean = nrm((c,))
        var = jax.random.uniform(next(keys), (c,), minval=0.5, maxval=1.5).astype(jnp.float32)
        s = gamma / jnp.sqrt(var + eps)
        return s, beta - mean * s

    p = {}
    p['dw1_w'] = nrm((3, 3, dim)); p['dw1_b'] = nrm((dim,))            # ResDWConv(dim, 3)
    p['ln_g'] = 1.0 + nrm((dim,)); p['ln_b'] = nrm((dim,))             # LayerNorm2d
    p['lk_w'] = nrm((kernel_size, kernel_size, dim))                   # lk_origin (7x7 dw)
    p['bn0_s'], p['bn0_o'] = bn_fold(dim)                              # origin_bn
    for name, k in (('br1', 5), ('br2', 3), ('br3', 3), ('br4', 3)):   # dilated branches
        p[name + '_w'] = nrm((k, k, dim))
        p[name + '_s'], p[name + '_o'] = bn_fold(dim)
    p['bn1_s'], p['bn1_o'] = bn_fold(dim)                              # nn.BatchNorm2d
    p['se_w1'] = nrm((dim, inner)); p['se_b1'] = nrm((inner,))         # SEModule
    p['se_w2'] = nrm((inner, dim)); p['se_b2'] = nrm((dim,))
    p['pw1_w'] = nrm((dim, M)); p['pw1_b'] = nrm((M,))                 # Conv2d(dim, mlp_dim, 1)
    p['dw2_w'] = nrm((3, 3, M)); p['dw2_b'] = nrm((M,))                # ResDWConv(mlp_dim, 3)
    p['grn_g'] = nrm((M,)); p['grn_b'] = nrm((M,))                     # GRN
    p['pw2_w'] = nrm((M, dim)); p['pw2_b'] = nrm((dim,))               # Conv2d(mlp_dim, dim, 1)
    return p


# ----------------------------------- main --------------------------------------

if __name__ == "__main__":
    key = jax.random.PRNGKey(0)
    kx, kp = jax.random.split(key)
    B, H, W, C = 2, 16, 16, 8          # dim=8, kernel_size=7, mlp_ratio=4 -> mlp_dim=32
    x = jax.random.normal(kx, (B, H, W, C), dtype=jnp.float32)
    params = init_params(kp, dim=C, kernel_size=7, mlp_ratio=4)

    out = rep_conv_block(x, params)
    out = jax.block_until_ready(out)

    ref = rep_conv_block_ref(x, params)
    assert out.shape == (B, H, W, C)
    assert bool(jnp.all(jnp.isfinite(out)))
    np.testing.assert_allclose(np.asarray(out), np.asarray(ref), rtol=2e-3, atol=2e-3)
    print("KERNEL_OK")
</pallas_src>

<mosaic_0001>
module attributes {stable_mosaic.version = 11 : i64} {
  func.func @_probe(%arg0: memref<8x128xf32, #tpu.memory_space<vmem>>, %arg1: memref<8x128xf32, #tpu.memory_space<vmem>>) attributes {dimension_semantics = [], scalar_prefetch = 0 : i64, scratch_operands = 0 : i64, tpu.core_type = #tpu.core_type<tc>} {
    %c0 = arith.constant 0 : index
    %c0_0 = arith.constant 0 : index
    %0 = vector.load %arg0[%c0, %c0_0] : memref<8x128xf32, #tpu.memory_space<vmem>>, vector<8x128xf32>
    %c1_i32 = arith.constant 1 : i32
    %1 = tpu.dynamic_rotate %0 by %c1_i32 dim 1 : vector<8x128xf32>, i32 -> vector<8x128xf32>
    %c0_1 = arith.constant 0 : index
    %c0_2 = arith.constant 0 : index
    %2 = vector.load %arg1[%c0_1, %c0_2] : memref<8x128xf32, #tpu.memory_space<vmem>>, vector<8x128xf32>
    tpu.vector_store %arg1[%c0_1, %c0_2], %1 {strides = array<i32>} : memref<8x128xf32, #tpu.memory_space<vmem>>, vector<8x128xf32>,
    return
  }
}

</mosaic_0001>

<bundles_post_ra>
// kernel: tpu_custom_call.1
= control target key start
LH: loop header
LB: loop body
LE: loop exit
PB: predicated region body
PF: predicated region fallthrough
CT: control target
= control target key end

     0   :  { %6 = vsyncpa [#allocation3], 0  ;;  %s106_s0 = inlined_call_operand.hbm [shape: f32[8,128], index: 0, kind: input, shape index: {}]   ;;  %s107_s1 = inlined_call_operand.hbm [shape: f32[8,128], index: 1, kind: output, shape index: {}]  }
   0x1   :  { %7 = vsyncpa [#allocation4], 0  ;;  %s87_s6 = smov [#allocation2]  }
   0x2   :  { %s14_s7 = sshll.u32 %s87_s6, 4  ;;  %s15_s7 = int_to_ptr.vmem [resolvable:$true] %s14_s7 }
   0x3   :  { %s51_s8 = scalar_lea.vmem %s15_s7, 128  ;;  %p56_p1 = scmp.lt.s32.totalorder %s15_s7, %s15_s7 }
   0x4   :  { %p52_p0 = scmp.ne.s32.totalorder %s15_s7, %s51_s8  ;;  %p57_p2 = scmp.lt.s32.totalorder %s51_s8, %s51_s8 }
   0x6   :  { %p58_p3 = por %p57_p2, %p56_p1 }
   0x8   :  { %p59_p4 = pnand %p58_p3, %p52_p0 }
   0xa   :  { %62 = shalt.err (!%p59_p4)
}
   0xb   :  { %17 = dma.hbm_to_vmem [thread:$0]  %s106_s0, 128, %s15_s7, [#allocation3]  }
   0xc   :  { %83 = dma.done.wait [#allocation3], 128  }
   0xd   :  { %84 = vsyncadd [#allocation3], 4294967168  ;;  %v21_v0 = vld [vmem:[#allocation2] sm:$0xff]  ;;  %s88_s11 = smov 1   ;;  %s89_s12 = smov [#allocation5]  }
   0xe   :  { %22 = vrot.lane.b32.xlu0 %v21_v0, %s88_s11  ;;  %s31_s13 = sshll.u32 %s89_s12, 4  ;;  %s32_s13 = int_to_ptr.vmem [resolvable:$true] %s31_s13 }
   0xf   :  { %s63_s14 = scalar_lea.vmem %s32_s13, 128  ;;  %p68_p6 = scmp.lt.s32.totalorder %s32_s13, %s32_s13 }
  0x10   :  { %p64_p5 = scmp.ne.s32.totalorder %s32_s13, %s63_s14  ;;  %p69_p7 = scmp.lt.s32.totalorder %s63_s14, %s63_s14 }
  0x12   :  { %p70_p8 = por %p69_p7, %p68_p6 }
  0x14   :  { %p71_p9 = pnand %p70_p8, %p64_p5 }
  0x80   :  { %v23_v1 = vpop.permute.xlu0 %22 }
  0x81   :  { %24 = vst [vmem:[#allocation5] sm:$0xff] %v23_v1 }
  0x82   :  { %74 = shalt.err (!%p71_p9)
}
  0x83   :  { %34 = dma.vmem_to_hbm [thread:$0]  %s32_s13, 128, %s107_s1, [#allocation4]  }
  0x84   :  { %85 = dma.done.wait [#allocation4], 128  }
  0x85   :  { %86 = vsyncadd [#allocation4], 4294967168 }
  0x86   :  { %38 = vsyncpa [#allocation3], 1 }
  0x87   :  { %39 = vsyncpa [#allocation4], 1 }

</bundles_post_ra>
